<compile_context>
chip_gen: v7x
topology: tpu7x:2x2x1
jax: 0.10.0
libtpu: 0.0.40
codegen_flags: <defaults>
</compile_context>

<pallas_src>
import math
import functools

import jax
import jax.numpy as jnp
from jax.experimental import pallas as pl
from jax.experimental.pallas import tpu as pltpu

# ----------------------------- config -------------------------------------
C_POS_EMB = 32
C_TIMESTEP_EMB = 32
C_S = 64
C_IN = C_POS_EMB + C_TIMESTEP_EMB
C_PACK = 2 * C_S          # 128: two residue rows per 128-lane vreg row
MAX_LEN = 2056            # max_len / max_positions used by the reference module


def _round_up(x, m):
    return ((x + m - 1) // m) * m


# --------------------- embedding helpers (plain JAX glue) -----------------
def get_index_embedding(indices, embed_size, max_len=MAX_LEN):
    """Sin/cos index embedding, matches flips' get_index_embedding."""
    k = jnp.arange(embed_size // 2, dtype=jnp.float32)
    denom = max_len ** (2.0 * k / embed_size)
    angles = indices[..., None] * jnp.pi / denom
    return jnp.concatenate([jnp.sin(angles), jnp.cos(angles)], axis=-1)


def get_time_embedding(timesteps, embedding_dim, max_positions=MAX_LEN):
    """Transformer-style timestep embedding, matches flips' get_time_embedding."""
    timesteps = timesteps.astype(jnp.float32) * max_positions
    half_dim = embedding_dim // 2
    emb = math.log(max_positions) / (half_dim - 1)
    emb = jnp.exp(jnp.arange(half_dim, dtype=jnp.float32) * -emb)
    emb = timesteps[:, None] * emb[None, :]
    # embedding_dim is even here; no zero-pad branch needed.
    return jnp.concatenate([jnp.sin(emb), jnp.cos(emb)], axis=1)


# ------------------------------ Pallas kernel ------------------------------
def node_embed_kernel(pproj_ref, tproj_ref, mask_ref, bias_ref, out_ref):
    # pproj_ref: (tr, 128)    lane-packed pos_emb @ W_pos (two residues / row)
    # tproj_ref: (1, 1, 128)  [t_proj | t_proj] for this batch element
    # mask_ref:  (1, tr, 2)   per-residue mask, paired to match the packing
    # bias_ref:  (1, 128)     [bias | bias]
    # out_ref:   (1, tr, 128) lane-packed output block
    tr = out_ref.shape[1]
    m = mask_ref[0]                                            # (tr, 2)
    lane = jax.lax.broadcasted_iota(jnp.int32, (tr, C_PACK), 1)
    # Expand the 2-lane mask to 128 lanes: lanes [0,64) take mask of residue
    # 2r, lanes [64,128) take mask of residue 2r+1. Pure full-width VPU work.
    m128 = jnp.where(lane < C_S, m[:, 0:1], m[:, 1:2])         # (tr, 128)
    out_ref[0] = m128 * (pproj_ref[...] + tproj_ref[0]) + bias_ref[...]


def _choose_tiling(num_res, batch, tr_max):
    """Pick packed-row tile size tr, padded packed-row count, and tile count."""
    n_pair = _round_up(max(num_res, 2), 2)       # residues paired 2-per-row
    r = n_pair // 2                              # packed rows
    n_tiles = max(1, -(-r // tr_max))            # minimal number of tiles
    if batch * n_tiles < 2 and r >= 16:
        n_tiles = 2                              # keep >=2 parallel steps (v7x: 2 TCs)
    tr = _round_up(-(-r // n_tiles), 8)          # rows per tile, multiple of 8
    r_pad = n_tiles * tr
    return tr, r_pad, n_tiles


def _node_embed_call(pos_proj_p, t_proj_p, mask_p, bias_p, *, tr, n_tiles):
    b = mask_p.shape[0]
    r_pad = mask_p.shape[1]
    return pl.pallas_call(
        node_embed_kernel,
        out_shape=jax.ShapeDtypeStruct((b, r_pad, C_PACK), jnp.float32),
        # Batch innermost -> pos_proj tile (index depends only on i) is reused
        # across batch steps without re-DMA.
        grid=(n_tiles, b),
        in_specs=[
            pl.BlockSpec((tr, C_PACK), lambda i, j: (i, 0)),
            pl.BlockSpec((1, 1, C_PACK), lambda i, j: (j, 0, 0)),
            pl.BlockSpec((1, tr, 2), lambda i, j: (j, i, 0)),
            pl.BlockSpec((1, C_PACK), lambda i, j: (0, 0)),
        ],
        out_specs=pl.BlockSpec((1, tr, C_PACK), lambda i, j: (j, i, 0)),
        compiler_params=pltpu.CompilerParams(
            # Independent output blocks on both axes -> megacore sharding ok.
            dimension_semantics=("parallel", "parallel"),
        ),
    )(pos_proj_p, t_proj_p, mask_p, bias_p)


# ------------------------------ forward ------------------------------------
@functools.partial(jax.jit, static_argnames=("tr_max", "force_pallas"))
def node_embedder_forward(timesteps, mask, weight, bias, *, tr_max=2048,
                          force_pallas=False):
    """timesteps: (B, 1) float32; mask: (B, N) float32. Returns (B, N, C_S)."""
    b, num_res = mask.shape

    # Small-problem fallback: below ~256 KiB of output, pallas_call launch +
    # per-step overhead exceeds the whole XLA-fused cost.
    if not force_pallas and b * num_res * C_S * 4 < (256 << 10):
        return node_embedder_reference(timesteps, mask, weight, bias)

    tr, r_pad, n_tiles = _choose_tiling(num_res, b, tr_max)
    n_pad = 2 * r_pad

    # Batch-invariant positional projection, hoisted out of the grid loop.
    pos = jnp.arange(num_res, dtype=jnp.float32)
    pos_emb = get_index_embedding(pos, C_POS_EMB, MAX_LEN)               # (N, 32)
    pos_proj = jnp.dot(pos_emb, weight[:C_POS_EMB],
                       precision=jax.lax.Precision.HIGHEST)              # (N, 64)
    pos_proj = jnp.pad(pos_proj, ((0, n_pad - num_res), (0, 0)))
    pos_proj_p = pos_proj.reshape(r_pad, C_PACK)                         # (R, 128)

    # Per-batch timestep projection, computed once per batch element.
    t_emb = get_time_embedding(timesteps[:, 0], C_TIMESTEP_EMB, MAX_LEN)  # (B, 32)
    t_proj = jnp.dot(t_emb, weight[C_POS_EMB:],
                     precision=jax.lax.Precision.HIGHEST)                # (B, 64)
    t_proj_p = jnp.concatenate([t_proj, t_proj], axis=-1)                # (B, 128)
    t_proj_p = t_proj_p.reshape(b, 1, C_PACK).astype(jnp.float32)

    bias_p = jnp.concatenate([bias.reshape(1, C_S)] * 2, axis=-1)        # (1, 128)

    mask_f = mask.astype(jnp.float32)
    mask_f = jnp.pad(mask_f, ((0, 0), (0, n_pad - num_res)))
    mask_p = mask_f.reshape(b, r_pad, 2)                                 # (B, R, 2)

    out = _node_embed_call(pos_proj_p, t_proj_p, mask_p, bias_p,
                           tr=tr, n_tiles=n_tiles)
    # Free row-major un-pack of the lane-paired output, then drop padding.
    return out.reshape(b, n_pad, C_S)[:, :num_res, :]


def node_embedder_reference(timesteps, mask, weight, bias):
    """Pure-JAX reference mirroring the PyTorch forward."""
    b, num_res = mask.shape
    pos = jnp.arange(num_res, dtype=jnp.float32)
    pos_emb = get_index_embedding(pos, C_POS_EMB, MAX_LEN)               # (N, 32)
    pos_emb = jnp.broadcast_to(pos_emb[None], (b, num_res, C_POS_EMB))
    pos_emb = pos_emb * mask[..., None]
    t_emb = get_time_embedding(timesteps[:, 0], C_TIMESTEP_EMB, MAX_LEN)
    t_emb = jnp.broadcast_to(t_emb[:, None, :], (b, num_res, C_TIMESTEP_EMB))
    t_emb = t_emb * mask[..., None]
    feats = jnp.concatenate([pos_emb, t_emb], axis=-1)
    return jnp.dot(feats, weight, precision=jax.lax.Precision.HIGHEST) + bias[0]


# TODO(synk): total_length_emb_dim / total_flex_emb_dim branches (and the
# local_flex input) are inactive for the default config (both dims == 0) and
# are not implemented in the kernel path.

# ------------------------------ main ---------------------------------------
if __name__ == "__main__":
    key = jax.random.PRNGKey(0)
    k_w, k_b, k_t, k_m = jax.random.split(key, 4)

    B, N = 2, 16

    # nn.Linear(C_IN, C_S) init: U(-1/sqrt(C_IN), 1/sqrt(C_IN)); stored transposed
    bound = 1.0 / math.sqrt(C_IN)
    weight = jax.random.uniform(
        k_w, (C_IN, C_S), dtype=jnp.float32, minval=-bound, maxval=bound
    )
    bias = jax.random.uniform(
        k_b, (1, C_S), dtype=jnp.float32, minval=-bound, maxval=bound
    )

    timesteps = jax.random.uniform(k_t, (B, 1), dtype=jnp.float32)        # in [0, 1)
    mask = jax.random.bernoulli(k_m, p=0.8, shape=(B, N)).astype(jnp.float32)

    # Small demo shape: force the Pallas path (fallback would otherwise apply).
    out = node_embedder_forward(timesteps, mask, weight, bias, force_pallas=True)
    out = jax.block_until_ready(out)
    ref = node_embedder_reference(timesteps, mask, weight, bias)
    assert out.shape == (B, N, C_S)
    assert jnp.allclose(out, ref, atol=1e-4, rtol=1e-4), "mismatch vs reference"

    # Odd residue count: exercises lane pairing + residue padding.
    N2 = 301
    mask2 = jax.random.bernoulli(
        jax.random.PRNGKey(1), p=0.8, shape=(B, N2)).astype(jnp.float32)
    out2 = node_embedder_forward(timesteps, mask2, weight, bias, force_pallas=True)
    out2 = jax.block_until_ready(out2)
    ref2 = node_embedder_reference(timesteps, mask2, weight, bias)
    assert out2.shape == (B, N2, C_S)
    assert jnp.allclose(out2, ref2, atol=1e-4, rtol=1e-4), "mismatch vs reference (odd N)"

    print("KERNEL_OK")
</pallas_src>

<mosaic_0001>
module attributes {stable_mosaic.version = 11 : i64} {
  func.func @node_embed_kernel(%arg0: i32, %arg1: i32, %arg2: memref<8x128xf32, #tpu.memory_space<vmem>>, %arg3: memref<1x1x128xf32, #tpu.memory_space<vmem>>, %arg4: memref<1x8x2xf32, #tpu.memory_space<vmem>>, %arg5: memref<1x128xf32, #tpu.memory_space<vmem>>, %arg6: memref<1x8x128xf32, #tpu.memory_space<vmem>>) attributes {dimension_semantics = [#tpu.dimension_semantics<parallel>, #tpu.dimension_semantics<parallel>], iteration_bounds = array<i64: 1, 2>, scalar_prefetch = 0 : i64, scratch_operands = 0 : i64, tpu.core_type = #tpu.core_type<tc>, window_params = [{transform_indices = @transform_0, window_bounds = array<i64: 8, 128>}, {transform_indices = @transform_1, window_bounds = array<i64: 1, 1, 128>}, {transform_indices = @transform_2, window_bounds = array<i64: 1, 8, 2>}, {pipeline_mode = #tpu.pipeline_mode<synchronous>, transform_indices = @transform_3, window_bounds = array<i64: 1, 128>}, {transform_indices = @transform_4, window_bounds = array<i64: 1, 8, 128>}]} {
    %c0 = arith.constant 0 : index
    %c0_0 = arith.constant 0 : index
    %c0_1 = arith.constant 0 : index
    %0 = vector.load %arg4[%c0, %c0_0, %c0_1] : memref<1x8x2xf32, #tpu.memory_space<vmem>>, vector<1x8x2xf32>
    %1 = vector.shape_cast %0 : vector<1x8x2xf32> to vector<8x2xf32>
    %2 = tpu.iota {dimensions = array<i32: 1>} : vector<8x128xi32>
    %c64_i32 = arith.constant 64 : i32
    %3 = vector.broadcast %c64_i32 : i32 to vector<8x128xi32>
    %4 = arith.cmpi slt, %2, %3 : vector<8x128xi32>
    %5 = vector.extract_strided_slice %1 {offsets = [0, 0], sizes = [8, 1], strides = [1, 1]} : vector<8x2xf32> to vector<8x1xf32>
    %6 = vector.extract_strided_slice %1 {offsets = [0, 1], sizes = [8, 1], strides = [1, 1]} : vector<8x2xf32> to vector<8x1xf32>
    %7 = vector.shape_cast %5 : vector<8x1xf32> to vector<8x1xf32>
    %8 = vector.broadcast %7 : vector<8x1xf32> to vector<8x128xf32>
    %9 = vector.shape_cast %6 : vector<8x1xf32> to vector<8x1xf32>
    %10 = vector.broadcast %9 : vector<8x1xf32> to vector<8x128xf32>
    %11 = arith.select %4, %8, %10 : vector<8x128xi1>, vector<8x128xf32>
    %c0_2 = arith.constant 0 : index
    %c0_3 = arith.constant 0 : index
    %12 = vector.load %arg2[%c0_2, %c0_3] : memref<8x128xf32, #tpu.memory_space<vmem>>, vector<8x128xf32>
    %c0_4 = arith.constant 0 : index
    %c0_5 = arith.constant 0 : index
    %c0_6 = arith.constant 0 : index
    %13 = vector.load %arg3[%c0_4, %c0_5, %c0_6] : memref<1x1x128xf32, #tpu.memory_space<vmem>>, vector<1x1x128xf32>
    %14 = vector.shape_cast %13 : vector<1x1x128xf32> to vector<1x128xf32>
    %15 = vector.broadcast %14 : vector<1x128xf32> to vector<8x128xf32>
    %16 = arith.addf %12, %15 : vector<8x128xf32>
    %17 = arith.mulf %11, %16 : vector<8x128xf32>
    %c0_7 = arith.constant 0 : index
    %c0_8 = arith.constant 0 : index
    %18 = vector.load %arg5[%c0_7, %c0_8] : memref<1x128xf32, #tpu.memory_space<vmem>>, vector<1x128xf32>
    %19 = vector.broadcast %18 : vector<1x128xf32> to vector<8x128xf32>
    %20 = arith.addf %17, %19 : vector<8x128xf32>
    %c0_9 = arith.constant 0 : index
    %c0_10 = arith.constant 0 : index
    %c0_11 = arith.constant 0 : index
    %21 = vector.load %arg6[%c0_9, %c0_10, %c0_11] : memref<1x8x128xf32, #tpu.memory_space<vmem>>, vector<1x8x128xf32>
    %22 = vector.shape_cast %21 : vector<1x8x128xf32> to vector<8x128xf32>
    %23 = vector.shape_cast %20 : vector<8x128xf32> to vector<1x8x128xf32>
    tpu.vector_store %arg6[%c0_9, %c0_10, %c0_11], %23 {strides = array<i32>} : memref<1x8x128xf32, #tpu.memory_space<vmem>>, vector<1x8x128xf32>,
    return
  }
  func.func @transform_0(%arg0: i32, %arg1: i32) -> (i32, i32) {
    %c0_i32 = arith.constant 0 : i32
    %c0_i32_0 = arith.constant 0 : i32
    return %arg0, %c0_i32 : i32, i32
  }
  func.func @transform_1(%arg0: i32, %arg1: i32) -> (i32, i32, i32) {
    %c0_i32 = arith.constant 0 : i32
    %c0_i32_0 = arith.constant 0 : i32
    %c0_i32_1 = arith.constant 0 : i32
    return %arg1, %c0_i32, %c0_i32_0 : i32, i32, i32
  }
  func.func @transform_2(%arg0: i32, %arg1: i32) -> (i32, i32, i32) {
    %c0_i32 = arith.constant 0 : i32
    %c0_i32_0 = arith.constant 0 : i32
    return %arg1, %arg0, %c0_i32 : i32, i32, i32
  }
  func.func @transform_3(%arg0: i32, %arg1: i32) -> (i32, i32) {
    %c0_i32 = arith.constant 0 : i32
    %c0_i32_0 = arith.constant 0 : i32
    %c0_i32_1 = arith.constant 0 : i32
    return %c0_i32, %c0_i32_0 : i32, i32
  }
  func.func @transform_4(%arg0: i32, %arg1: i32) -> (i32, i32, i32) {
    %c0_i32 = arith.constant 0 : i32
    %c0_i32_0 = arith.constant 0 : i32
    return %arg1, %arg0, %c0_i32 : i32, i32, i32
  }
}

</mosaic_0001>

<bundles_post_ra>
// kernel: node_embedder_forward.1
= control target key start
LH: loop header
LB: loop body
LE: loop exit
PB: predicated region body
PF: predicated region fallthrough
CT: control target
= control target key end

     0   :  { %s478_s15 = smov 0   ;;  %s480_s16 = smov 0   ;;  %s520_s0 = inlined_call_operand.vmem [shape: f32[8,128], index: 0, kind: input, shape index: {}]   ;;  %s521_s1 = inlined_call_operand.vmem [shape: f32[2,1,128], index: 1, kind: input, shape index: {}]   ;;  %s522_s2 = inlined_call_operand.vmem [shape: f32[2,8,2], index: 2, kind: input, shape index: {}]   ;;  %s523_s3 = inlined_call_operand.vmem [shape: f32[1,128], index: 3, kind: input, shape index: {}]   ;;  %s524_s4 = inlined_call_operand.vmem [shape: f32[2,8,128], index: 4, kind: output, shape index: {}]  }
   0x1   :  { %s482_s17 = smov 0  }
   0x2 LB: > { %s23_s18 = sadd.s32 1, %s445_s16  ;;  %p392_p0 = scmp.ge.s32.totalorder %s449_s17, 1  ;;  %s449_s17 = sphi %s482_s17, %s14_s17   ;;  %s445_s16 = sphi %s480_s16, %s526_s16   ;;  %s441_s15 = sphi %s478_s15, %s525_s15  }
   0x3   : > { %p24_p1 = scmp.ge.s32.totalorder %s23_s18, 2  ;;  %p197_p2 = scmp.lt.s32.totalorder %s449_s17, 3 }
   0x5   : > { %s528_s18 = smov (%p24_p1, %s23_s18), 0  ;;  %p198_p3 = pnand %p392_p0, %p197_p2 }
   0x6   : > { %p238_p4 = scmp.lt.s32.totalorder (!%p198_p3), %s441_s15, 1  ;;  %v451_v0 = vmov (!%p198_p3), 0   ;;  %v452_v2 = vmov (!%p198_p3), 1   ;;  %v256_v3 = vlaneseq (!%p198_p3)  ;;  %v269_v6 = vld [vmem:[%s520_s0] sm:$0xff] (!%p198_p3) }
   0x7   : > { %201 = sbr.rel (%p198_p3) target bundleno = 157 (0x9d), region = 36  ;;  %425 = vset.pattern.permute.xlu0 (!%p198_p3), %v451_v0  ;;  %v396_v10 = vld [vmem:[%s523_s3] ss:$0 sm:$0xff] (!%p198_p3) }
   0x8   : > { %v257_v4 = vand.u32 (!%p198_p3), 127, %v256_v3 }
   0xa   : > { %vm258_vm0 = vcmp.lt.s32.totalorder (!%p198_p3), %v257_v4, 64 }
   0xe   : > { %s530_s15 = smov (!%p238_p4, %s441_s15), 1 }
   0xf   : > { %s393_s19 = sshll.u32 %s530_s15, 3  ;;  %s240_s25 = scalar_lea.vmem %s521_s1, %s530_s15 }
  0x10   : > { %s247_s22 = scalar_lea.vmem %s522_s2, %s393_s19  ;;  %v395_v7 = vld [vmem:[%s240_s25] ss:$0 sm:$0xff]  ;;  %s254_s6 = scalar_lea.vmem %s524_s4, %s393_s19 }
  0x11   : > { %v255_v1 = vld [vmem:[%s247_s22] sm:$0xff]  ;;  %v277_v8 = vadd.f32 %v395_v7, %v269_v6 }
  0x12   : > { %261 = vperm.xlu0 %425, %v255_v1  }
  0x16   : > { %426 = vset.pattern.permute.xlu0 %v452_v2 }
  0x17   : > { %265 = vperm.xlu0 %426, %v255_v1  }
  0x91   : > { %v262_v5 = vpop.permute.xlu0 %261 }
  0x96   : > { %v266_v9 = vpop.permute.xlu0 %265 }
  0x97   : > { %v268_v11 = vsel %vm258_vm0, %v262_v5, %v266_v9 }
  0x98   : > { %v278_v12 = vmul.f32 %v277_v8, %v268_v11 }
  0x9a   : > { %v286_v13 = vadd.f32 %v396_v10, %v278_v12 }
  0x9c   : > { %287 = vst [vmem:[%s254_s6] sm:$0xff] %v286_v13 }
  0x9d PF: > { %s14_s17 = sadd.s32 1, %s449_s17   ;;  %s525_s15 = smov %s445_s16 }
  0x9e   : > { %p11_p5 = scmp.ge.s32.totalorder %s14_s17, 4   ;;  %s526_s16 = smov %s528_s18 }
  0xa0   :  { %13 = sbr.rel (!%p11_p5) target bundleno = 2 (0x2), region = 72 }

</bundles_post_ra>
